<compile_context>
chip_gen: v5e
topology: v5e:2x2
jax: 0.10.0
libtpu: 0.0.40
codegen_flags: <defaults>
</compile_context>

<pallas_src>
import jax
import jax.numpy as jnp
from jax.experimental import pallas as pl
from jax.experimental.pallas import tpu as pltpu

_LANE = 128
_MIB = 1 << 20

# Conservative per-TensorCore VMEM budgets (v7x has only 64 MiB/TC; v5e/v6e 128).
_WEIGHT_TILE_BUDGET = 8 * _MIB   # one buffered copy of a (W1, W2) hidden tile, bf16
_ACT_TILE_BUDGET = 16 * _MIB     # double-buffered x/out tiles + f32 accumulator
_VMEM_CEILING = 48 * _MIB        # never ask Mosaic for more than this


def _round_up(x, m):
    return ((x + m - 1) // m) * m


def _cdiv(a, b):
    return -(-a // b)


def mlp_kernel(x_ref, w1_ref, b1_ref, w2_ref, b2_ref, o_ref, acc_ref):
    """One (batch-tile, hidden-tile) grid step of relu(x@W1+b1)@W2+b2."""
    j = pl.program_id(1)                      # hidden-tile index (reduction axis)

    @pl.when(j == 0)
    def _init():
        acc_ref[...] = jnp.zeros_like(acc_ref)

    # Cast x to bf16 in-kernel (VPU) so the wrapper never materializes a bf16
    # copy of x in HBM.  Both matmuls: bf16 operands, f32 accumulation (MXU).
    x_bf16 = x_ref[...].astype(jnp.bfloat16)
    h = jnp.dot(x_bf16, w1_ref[...], preferred_element_type=jnp.float32)
    h = jnp.maximum(h + b1_ref[...], 0.0)                       # bias + ReLU (VPU)
    acc_ref[...] += jnp.dot(h.astype(jnp.bfloat16), w2_ref[...],
                            preferred_element_type=jnp.float32)

    @pl.when(j == pl.num_programs(1) - 1)
    def _finalize():
        o_ref[...] = (acc_ref[...] + b2_ref[...]).astype(o_ref.dtype)


def _plan_hidden_tiling(d_in, h, d_out):
    """Pick the hidden-dim tile th (multiple of 128) so one buffered copy of the
    corresponding W1/W2 slices stays under _WEIGHT_TILE_BUDGET (Pallas
    double-buffers inputs by default, so 2x that is what ends up resident)."""
    h_pad_min = _round_up(h, _LANE)
    full_bytes = 2 * h_pad_min * (d_in + d_out)            # bf16 W1 + W2
    n_h = max(1, _cdiv(full_bytes, _WEIGHT_TILE_BUDGET))
    th = _round_up(_cdiv(h_pad_min, n_h), _LANE)
    n_h = _cdiv(h_pad_min, th)
    return th, n_h, n_h * th                                # padded hidden size


def _pick_tn(n, d_in, d_out, max_tn=512):
    """Batch-tile size: 16-row aligned, VMEM-bounded, and (for medium/large N)
    an even number of tiles so both v7x TensorCores get balanced work."""
    per_row = 4 * (2 * d_in + 3 * d_out)     # 2x f32 x buf + 2x f32 out buf + f32 acc
    cap = max(16, (_ACT_TILE_BUDGET // per_row) // 16 * 16)
    tn = min(max_tn, cap)
    if n < 16:
        return _round_up(n, 8)               # tiny batch: one exact sublane-aligned tile
    if _round_up(n, 16) <= tn:
        if n <= 32:
            return _round_up(n, 16)
        return _round_up(_cdiv(n, 2), 16)    # two balanced tiles
    n_tiles = 2 * _cdiv(_cdiv(n, tn), 2)     # even tile count, each <= tn
    return _round_up(_cdiv(n, n_tiles), 16)


def prepare_params(w1, b1, w2, b2):
    """One-time (model init) padding + bf16 cast of the weights/biases.

    w1: (D_in, H), b1: (H,) or (1, H), w2: (H, D_out), b2: (D_out,) or (1, D_out).
    Only the hidden dim H is padded (to a multiple of the H-tile); the padding
    is mathematically inert (zero W1 cols / b1 entries / W2 rows, ReLU(0)=0).
    """
    d_in, h = w1.shape
    d_out = w2.shape[1]
    th, n_h, h_pad = _plan_hidden_tiling(d_in, h, d_out)

    w1_p = jnp.zeros((d_in, h_pad), jnp.bfloat16).at[:, :h].set(
        w1.astype(jnp.bfloat16))
    b1_p = jnp.zeros((1, h_pad), jnp.float32).at[:, :h].set(
        b1.reshape(1, h).astype(jnp.float32))
    w2_p = jnp.zeros((h_pad, d_out), jnp.bfloat16).at[:h, :].set(
        w2.astype(jnp.bfloat16))
    b2_p = b2.reshape(1, d_out).astype(jnp.float32)
    return dict(w1=w1_p, b1=b1_p, w2=w2_p, b2=b2_p, th=th, n_h=n_h)


def my_model_forward(x, params):
    """x: (N, D_in) f32; params: output of prepare_params.  Returns (N, D_out) f32."""
    w1_p, b1_p = params["w1"], params["b1"]
    w2_p, b2_p = params["w2"], params["b2"]
    th, n_h = params["th"], params["n_h"]

    n, d_in = x.shape
    d_out = w2_p.shape[1]

    tn = _pick_tn(n, d_in, d_out)
    grid = (_cdiv(n, tn), n_h)

    # VMEM requirement: double-buffered x/out tiles, f32 accumulator,
    # double-buffered weight/bias tiles, plus margin for Mosaic internals.
    need = (2 * tn * d_in * 4                       # x tiles (f32)
            + 2 * tn * d_out * 4                    # out tiles (f32)
            + tn * d_out * 4                        # accumulator (f32)
            + 2 * (d_in * th + th * d_out) * 2      # W1/W2 tiles (bf16)
            + 2 * (th + d_out) * 4)                 # biases (f32)
    vmem_limit = min(need * 3 // 2 + 2 * _MIB, _VMEM_CEILING)
    vmem_limit = int(max(vmem_limit, need + 2 * _MIB, 16 * _MIB))

    h_pad = th * n_h
    cost = pl.CostEstimate(
        flops=2 * n * (d_in * h_pad + h_pad * d_out),
        transcendentals=0,
        bytes_accessed=(x.size * x.dtype.itemsize
                        + w1_p.size * 2 + w2_p.size * 2
                        + b1_p.size * 4 + b2_p.size * 4
                        + n * d_out * 4),
    )

    return pl.pallas_call(
        mlp_kernel,
        out_shape=jax.ShapeDtypeStruct((n, d_out), jnp.float32),
        grid_spec=pltpu.PrefetchScalarGridSpec(
            num_scalar_prefetch=0,
            grid=grid,
            in_specs=[
                pl.BlockSpec((tn, d_in), lambda i, j: (i, 0)),    # x rows (pipelined, resident over H axis)
                pl.BlockSpec((d_in, th), lambda i, j: (0, j)),    # W1 hidden tile
                pl.BlockSpec((1, th), lambda i, j: (0, j)),       # b1 hidden tile
                pl.BlockSpec((th, d_out), lambda i, j: (j, 0)),   # W2 hidden tile
                pl.BlockSpec((1, d_out), lambda i, j: (0, 0)),    # b2 (resident)
            ],
            out_specs=pl.BlockSpec((tn, d_out), lambda i, j: (i, 0)),
            scratch_shapes=[pltpu.VMEM((tn, d_out), jnp.float32)],
        ),
        compiler_params=pltpu.CompilerParams(
            # Batch tiles independent -> shard across both TCs on v7x;
            # hidden axis is a reduction into the accumulator -> arbitrary.
            dimension_semantics=("parallel", "arbitrary"),
            vmem_limit_bytes=vmem_limit,
        ),
        cost_estimate=cost,
    )(x, w1_p, b1_p, w2_p, b2_p)


if __name__ == "__main__":
    # Small shapes implied by MyModel(D_in, H, D_out) acting on a batch of vectors.
    N, D_in, H, D_out = 8, 32, 64, 16

    key = jax.random.PRNGKey(0)
    kx, kw1, kb1, kw2, kb2 = jax.random.split(key, 5)

    x = jax.random.normal(kx, (N, D_in), dtype=jnp.float32)

    # PyTorch-style uniform(-1/sqrt(fan_in), 1/sqrt(fan_in)) init, stored as
    # [in, out] so the kernel does x @ W directly.
    bound1 = 1.0 / jnp.sqrt(jnp.float32(D_in))
    w1 = jax.random.uniform(kw1, (D_in, H), jnp.float32, -bound1, bound1)
    b1 = jax.random.uniform(kb1, (1, H), jnp.float32, -bound1, bound1)

    bound2 = 1.0 / jnp.sqrt(jnp.float32(H))
    w2 = jax.random.uniform(kw2, (H, D_out), jnp.float32, -bound2, bound2)
    b2 = jax.random.uniform(kb2, (1, D_out), jnp.float32, -bound2, bound2)

    # One-time weight preparation (padding + bf16 cast), then the lean forward.
    params = prepare_params(w1, b1, w2, b2)

    y = my_model_forward(x, params)
    y = jax.block_until_ready(y)
    assert y.shape == (N, D_out)

    # Reference 1: same math with matching bf16 operands / f32 accumulation.
    xb, w1b, w2b = (a.astype(jnp.bfloat16) for a in (x, w1, w2))
    h_ref = jnp.maximum(
        jnp.dot(xb, w1b, preferred_element_type=jnp.float32) + b1, 0.0)
    y_ref_bf16 = jnp.dot(h_ref.astype(jnp.bfloat16), w2b,
                         preferred_element_type=jnp.float32) + b2
    assert jnp.allclose(y, y_ref_bf16, atol=1e-3, rtol=1e-3)

    # Reference 2: pure f32 math (bf16-operand precision trade-off -> looser tol).
    y_ref_f32 = jnp.maximum(x @ w1 + b1, 0.0) @ w2 + b2
    assert jnp.allclose(y, y_ref_f32, atol=5e-2, rtol=5e-2)

    print("KERNEL_OK")
</pallas_src>

<mosaic_0001>
module attributes {stable_mosaic.version = 11 : i64} {
  func.func @mlp_kernel(%arg0: i32, %arg1: i32, %arg2: memref<8x32xf32, #tpu.memory_space<vmem>>, %arg3: memref<32x128xbf16, #tpu.memory_space<vmem>>, %arg4: memref<1x128xf32, #tpu.memory_space<vmem>>, %arg5: memref<128x16xbf16, #tpu.memory_space<vmem>>, %arg6: memref<1x16xf32, #tpu.memory_space<vmem>>, %arg7: memref<8x16xf32, #tpu.memory_space<vmem>>, %arg8: memref<8x16xf32, #tpu.memory_space<vmem>>) attributes {dimension_semantics = [#tpu.dimension_semantics<parallel>, #tpu.dimension_semantics<arbitrary>], iteration_bounds = array<i64: 1, 1>, scalar_prefetch = 0 : i64, scratch_operands = 1 : i64, tpu.core_type = #tpu.core_type<tc>, window_params = [{transform_indices = @transform_0, window_bounds = array<i64: 8, 32>}, {transform_indices = @transform_1, window_bounds = array<i64: 32, 128>}, {transform_indices = @transform_2, window_bounds = array<i64: 1, 128>}, {transform_indices = @transform_3, window_bounds = array<i64: 128, 16>}, {pipeline_mode = #tpu.pipeline_mode<synchronous>, transform_indices = @transform_4, window_bounds = array<i64: 1, 16>}, {transform_indices = @transform_5, window_bounds = array<i64: 8, 16>}]} {
    %c0_i32 = arith.constant 0 : i32
    %0 = arith.cmpi eq, %arg1, %c0_i32 : i32
    %1 = arith.extui %0 : i1 to i32
    %c0_i32_0 = arith.constant 0 : i32
    %2 = arith.cmpi ne, %1, %c0_i32_0 : i32
    scf.if %2 {
      %cst_16 = arith.constant 0.000000e+00 : f32
      %21 = vector.broadcast %cst_16 : f32 to vector<8x16xf32>
      %c0_17 = arith.constant 0 : index
      %c0_18 = arith.constant 0 : index
      %22 = vector.load %arg8[%c0_17, %c0_18] : memref<8x16xf32, #tpu.memory_space<vmem>>, vector<8x16xf32>
      tpu.vector_store %arg8[%c0_17, %c0_18], %21 {strides = array<i32>} : memref<8x16xf32, #tpu.memory_space<vmem>>, vector<8x16xf32>,
    } else {
    }
    %c0 = arith.constant 0 : index
    %c0_1 = arith.constant 0 : index
    %3 = vector.load %arg2[%c0, %c0_1] : memref<8x32xf32, #tpu.memory_space<vmem>>, vector<8x32xf32>
    %4 = arith.truncf %3 : vector<8x32xf32> to vector<8x32xbf16>
    %c0_2 = arith.constant 0 : index
    %c0_3 = arith.constant 0 : index
    %5 = vector.load %arg3[%c0_2, %c0_3] : memref<32x128xbf16, #tpu.memory_space<vmem>>, vector<32x128xbf16>
    %cst = arith.constant dense<0.000000e+00> : vector<8x128xf32>
    %6 = tpu.matmul %4, %5, %cst {dimension_numbers = #tpu.dot_dimension_numbers<[1], [0], [0], [1], [0, 0, 1, 1], [], []>} : vector<8x32xbf16>, vector<32x128xbf16>, vector<8x128xf32> -> vector<8x128xf32>
    %c0_4 = arith.constant 0 : index
    %c0_5 = arith.constant 0 : index
    %7 = vector.load %arg4[%c0_4, %c0_5] : memref<1x128xf32, #tpu.memory_space<vmem>>, vector<1x128xf32>
    %8 = vector.broadcast %7 : vector<1x128xf32> to vector<8x128xf32>
    %9 = arith.addf %6, %8 : vector<8x128xf32>
    %cst_6 = arith.constant 0.000000e+00 : f32
    %10 = vector.broadcast %cst_6 : f32 to vector<8x128xf32>
    %11 = arith.maximumf %9, %10 : vector<8x128xf32>
    %c0_7 = arith.constant 0 : index
    %c0_8 = arith.constant 0 : index
    %12 = vector.load %arg8[%c0_7, %c0_8] : memref<8x16xf32, #tpu.memory_space<vmem>>, vector<8x16xf32>
    %13 = arith.truncf %11 : vector<8x128xf32> to vector<8x128xbf16>
    %c0_9 = arith.constant 0 : index
    %c0_10 = arith.constant 0 : index
    %14 = vector.load %arg5[%c0_9, %c0_10] : memref<128x16xbf16, #tpu.memory_space<vmem>>, vector<128x16xbf16>
    %cst_11 = arith.constant dense<0.000000e+00> : vector<8x16xf32>
    %15 = tpu.matmul %13, %14, %cst_11 {dimension_numbers = #tpu.dot_dimension_numbers<[1], [0], [0], [1], [0, 0, 1, 1], [], []>} : vector<8x128xbf16>, vector<128x16xbf16>, vector<8x16xf32> -> vector<8x16xf32>
    %16 = arith.addf %12, %15 : vector<8x16xf32>
    %c0_12 = arith.constant 0 : index
    %c0_13 = arith.constant 0 : index
    %17 = vector.load %arg8[%c0_12, %c0_13] : memref<8x16xf32, #tpu.memory_space<vmem>>, vector<8x16xf32>
    tpu.vector_store %arg8[%c0_12, %c0_13], %16 {strides = array<i32>} : memref<8x16xf32, #tpu.memory_space<vmem>>, vector<8x16xf32>,
    %c0_i32_14 = arith.constant 0 : i32
    %18 = arith.cmpi eq, %arg1, %c0_i32_14 : i32
    %19 = arith.extui %18 : i1 to i32
    %c0_i32_15 = arith.constant 0 : i32
    %20 = arith.cmpi ne, %19, %c0_i32_15 : i32
    scf.if %20 {
      %c0_16 = arith.constant 0 : index
      %c0_17 = arith.constant 0 : index
      %21 = vector.load %arg8[%c0_16, %c0_17] : memref<8x16xf32, #tpu.memory_space<vmem>>, vector<8x16xf32>
      %c0_18 = arith.constant 0 : index
      %c0_19 = arith.constant 0 : index
      %22 = vector.load %arg6[%c0_18, %c0_19] : memref<1x16xf32, #tpu.memory_space<vmem>>, vector<1x16xf32>
      %23 = vector.broadcast %22 : vector<1x16xf32> to vector<8x16xf32>
      %24 = arith.addf %21, %23 : vector<8x16xf32>
      %c0_20 = arith.constant 0 : index
      %c0_21 = arith.constant 0 : index
      %25 = vector.load %arg7[%c0_20, %c0_21] : memref<8x16xf32, #tpu.memory_space<vmem>>, vector<8x16xf32>
      tpu.vector_store %arg7[%c0_20, %c0_21], %24 {strides = array<i32>} : memref<8x16xf32, #tpu.memory_space<vmem>>, vector<8x16xf32>,
    } else {
    }
    return
  }
  func.func @transform_0(%arg0: i32, %arg1: i32) -> (i32, i32) {
    %c0_i32 = arith.constant 0 : i32
    %c0_i32_0 = arith.constant 0 : i32
    return %arg0, %c0_i32 : i32, i32
  }
  func.func @transform_1(%arg0: i32, %arg1: i32) -> (i32, i32) {
    %c0_i32 = arith.constant 0 : i32
    %c0_i32_0 = arith.constant 0 : i32
    return %c0_i32, %arg1 : i32, i32
  }
  func.func @transform_2(%arg0: i32, %arg1: i32) -> (i32, i32) {
    %c0_i32 = arith.constant 0 : i32
    %c0_i32_0 = arith.constant 0 : i32
    return %c0_i32, %arg1 : i32, i32
  }
  func.func @transform_3(%arg0: i32, %arg1: i32) -> (i32, i32) {
    %c0_i32 = arith.constant 0 : i32
    %c0_i32_0 = arith.constant 0 : i32
    return %arg1, %c0_i32 : i32, i32
  }
  func.func @transform_4(%arg0: i32, %arg1: i32) -> (i32, i32) {
    %c0_i32 = arith.constant 0 : i32
    %c0_i32_0 = arith.constant 0 : i32
    %c0_i32_1 = arith.constant 0 : i32
    return %c0_i32, %c0_i32_0 : i32, i32
  }
  func.func @transform_5(%arg0: i32, %arg1: i32) -> (i32, i32) {
    %c0_i32 = arith.constant 0 : i32
    %c0_i32_0 = arith.constant 0 : i32
    return %arg0, %c0_i32 : i32, i32
  }
}

</mosaic_0001>

<bundles_post_ra>
// kernel: tpu_custom_call.1
= control target key start
LH: loop header
LB: loop body
LE: loop exit
PB: predicated region body
PF: predicated region fallthrough
CT: control target
= control target key end

     0   :  { %s334_s0 = inlined_call_operand.vmem [shape: f32[8,32], index: 0, kind: input, shape index: {}]   ;;  %s335_s1 = inlined_call_operand.vmem [shape: bf16[32,128], index: 1, kind: input, shape index: {}]   ;;  %s336_s2 = inlined_call_operand.vmem [shape: f32[1,128], index: 2, kind: input, shape index: {}]   ;;  %s337_s3 = inlined_call_operand.vmem [shape: bf16[128,16], index: 3, kind: input, shape index: {}]   ;;  %s338_s4 = inlined_call_operand.vmem [shape: f32[1,16], index: 4, kind: input, shape index: {}]   ;;  %s339_s5 = inlined_call_operand.hbm [shape: f32[8,16], index: 5, kind: output, shape index: {}]  }
   0x1   :  { %v218_v0 = vld [vmem:[%s335_s1 + $0x8] sm:$0xff]  ;;  %v226_v1 = vld [vmem:[%s337_s3 + $0x38] sm:$0xff]  ;;  %v217_v2 = vld [vmem:[%s335_s1] sm:$0xff] }
   0x2   :  { %60 = vmatpush.bf16.msra.mxu0 %v218_v0  ;;  %v28_v3 = vld [vmem:[%s334_s0] sm:$0xff]  ;;  %134 = vmatpush.bf16.msra.mxu1 %v226_v1  ;;  %v225_v4 = vld [vmem:[%s337_s3 + $0x30] sm:$0xff] }
   0x3   :  { %10 = vsyncpa [#allocation4], 0  ;;  %v29_v5 = vpack.c.bf16 %v28_v3, %v28_v3  ;;  %vm50_vm0 = vcmask 261120   ;;  %v224_v6 = vld [vmem:[%s337_s3 + $0x28] sm:$0xff]  ;;  %v223_v7 = vld [vmem:[%s337_s3 + $0x20] sm:$0xff]  ;;  %vm26_vm1 = vcmask 130048  }
   0x4   :  { %v222_v8 = vld [vmem:[%s337_s3 + $0x18] sm:$0xff]  ;;  %v221_v9 = vld [vmem:[%s337_s3 + $0x10] sm:$0xff]  ;;  %v220_v10 = vld [vmem:[%s337_s3 + $0x8] sm:$0xff]  ;;  %v257_v12 = vmov 0.0   ;;  %s258_s16 = smov [#allocation3]   ;;  %s167_s19 = sshll.u32 %s339_s5, 4  ;;  %s168_s19 = int_to_ptr.hbm [resolvable:$true] %s167_s19 }
   0x5   :  { %v219_v11 = vld [vmem:[%s337_s3] sm:$0xff]  ;;  %27 = vst.msk [vmem:[#allocation2] sm:$0xff] %vm26_vm1, %v257_v12  ;;  %s165_s17 = sshll.u32 %s258_s16, 4  ;;  %s166_s17 = int_to_ptr.vmem [resolvable:$true] %s165_s17 }
   0x6   :  { %61 = vmatpush.bf16.msra.mxu0 %v217_v2  ;;  %135 = vmatpush.bf16.msra.mxu1 %v225_v4  ;;  %v229_v13 = vld [vmem:[%s336_s2] ss:$0 sm:$0xff] }
   0x7   :  { %v230_v22 = vld [vmem:[%s338_s4] ss:$0 sm:$0xff] }
   0x9   :  { %184 = vmatmul.msk.bf16.vlgmr.msra.gmra.mxu0 %vm50_vm0, %v29_v5 }
   0xa   :  { %136 = vmatpush.bf16.msra.mxu1 %v224_v6 }
   0xc   :  { %v68_v19 = vld [vmem:[#allocation2] sm:$0xff] }
   0xe   :  { %137 = vmatpush.bf16.msra.mxu1 %v223_v7 }
  0x12   :  { %138 = vmatpush.bf16.msra.mxu1 %v222_v8 }
  0x16   :  { %139 = vmatpush.bf16.msra.mxu1 %v221_v9 }
  0x1a   :  { %140 = vmatpush.bf16.msra.mxu1 %v220_v10 }
  0x1e   :  { %141 = vmatpush.bf16.msra.mxu1 %v219_v11 }
  0x86   :  { %v63_v14 = vpop.f32.mrf.mxu0 }
  0x87   :  { %v64_v15 = vadd.f32 %v229_v13, %v63_v14 }
  0x89   :  { %v67_v16 = vmax.f32 %v64_v15, 0.0 }
  0x8b   :  { %v69_v17 = vpack.c.bf16 %v67_v16, %v67_v16 }
  0x8d   :  { %142 = vmatmul.bf16.vlgmr.msra.gmra.mxu1 %v69_v17 }
  0x8e   :  { %v65_v18 = vpop.f32.mrf.mxu0 }
 0x10a   :  { %v143_v20 = vpop.f32.mrf.mxu1 }
 0x10b   :  { %v147_v21 = vadd.f32 %v143_v20, %v68_v19 }
 0x10d   :  { %149 = vst.msk [vmem:[#allocation2] sm:$0xff] %vm26_vm1, %v147_v21 }
 0x112   :  { %v145_v23 = vpop.f32.mrf.mxu1 }
 0x114   :  { %v153_v24 = vld [vmem:[#allocation2] sm:$0xff] }
 0x115   :  { %v158_v25 = vadd.f32 %v230_v22, %v153_v24 }
 0x117   :  { %159 = vst.msk [vmem:[#allocation3] sm:$0xff] %vm26_vm1, %v158_v25 }
 0x118   :  { %170 = dma.vmem_to_hbm [thread:$0]  %s166_s17, 128, %s168_s19, [#allocation4]  }
 0x119   :  { %255 = dma.done.wait [#allocation4], 128  }
 0x11a   :  { %256 = vsyncadd [#allocation4], 4294967168 }
 0x11b   :  { %175 = vsyncpa [#allocation4], 1 }

</bundles_post_ra>
